<compile_context>
chip_gen: v6e
topology: v6e:2x2x1
jax: 0.10.0
libtpu: 0.0.40
codegen_flags: <defaults>
</compile_context>

<pallas_src>
import math
from functools import lru_cache, partial

import jax
import jax.numpy as jnp
import numpy as np
from jax.experimental import pallas as pl
from jax.experimental.pallas import tpu as pltpu


# Temporal (FixedEmbedding) vocab sizes for freq='h' and their row offsets in
# the fused table: month(13) | day(32) | weekday(7) | hour(24) = 76 rows,
# zero-padded to 128 rows so the one-hot contraction block is lane-aligned.
# x_mark column order is (month, day, weekday, hour).
_TEMPORAL_SIZES = (13, 32, 7, 24)
_TEMPORAL_OFFSETS = (0, 13, 45, 52)
_TEMPORAL_ROWS = 128
_LANE = 128
_TARGET_ROWS = 512                      # target MXU M rows per grid step
_VMEM_BUDGET = 16 * 1024 * 1024         # conservative per-step budget (v7x-safe)


def _round_up(x: int, m: int) -> int:
    return (x + m - 1) // m * m


# ----------------------------- parameter setup -----------------------------

def _sinusoid_table_np(n_rows: int, d_model: int) -> np.ndarray:
    """Matches the PE / FixedEmbedding table construction in the PyTorch code."""
    assert d_model % 2 == 0, "sinusoidal tables require an even d_model"
    pos = np.arange(n_rows, dtype=np.float32)[:, None]
    div = np.exp(
        np.arange(0, d_model, 2, dtype=np.float32) * -(math.log(10000.0) / d_model)
    )
    ang = pos * div
    tab = np.zeros((n_rows, d_model), np.float32)
    tab[:, 0::2] = np.sin(ang)
    tab[:, 1::2] = np.cos(ang)
    return tab


@lru_cache(maxsize=None)
def _temporal_table_np(d_model: int, d_pad: int) -> np.ndarray:
    """month|day|weekday|hour sinusoid tables stacked, zero-padded to [128, d_pad]."""
    tab = np.zeros((_TEMPORAL_ROWS, d_pad), np.float32)
    for size, off in zip(_TEMPORAL_SIZES, _TEMPORAL_OFFSETS):
        tab[off:off + size, :d_model] = _sinusoid_table_np(size, d_model)
    return tab


@lru_cache(maxsize=None)
def _positional_table_np(seq_len: int, d_model: int, d_pad: int) -> np.ndarray:
    tab = np.zeros((seq_len, d_pad), np.float32)
    tab[:, :d_model] = _sinusoid_table_np(seq_len, d_model)
    return tab


def kaiming_conv_weight(key, c_in: int, d_model: int, ksize: int = 3) -> jnp.ndarray:
    """Deterministic stand-in for nn.init.kaiming_normal_(fan_in, leaky_relu)."""
    a = 0.01
    gain = math.sqrt(2.0 / (1.0 + a * a))
    std = gain / math.sqrt(c_in * ksize)
    return std * jax.random.normal(key, (d_model, c_in, ksize), dtype=jnp.float32)


# ------------------------------- Pallas kernel ------------------------------

def _data_embedding_kernel(x_ref, mark_ref, w_ref, pe_ref, o_ref, *, k_conv_pad):
    # x_ref   : [TB, L, C]         value series (TB batch rows per grid step)
    # mark_ref: [TB, L, 4] int32   temporal indices, pre-offset into fused table
    # w_ref   : [3C_pad+128, Dp]   [w_prev; w_cur; w_next; 0-pad; temporal table]
    # pe_ref  : [L, Dp]            positional embedding (Dp = d_model padded to 128)
    # o_ref   : [TB, L, Dp]
    tb, L, C = x_ref.shape
    dt = w_ref.dtype

    # Fused matmul operand: [ x[l-1] | x[l] | x[l+1] | 0-pad | multi-hot(128) ].
    # The zero filler lane-aligns the temporal block at lane k_conv_pad.
    x = x_ref[...]
    pieces = [jnp.roll(x, 1, axis=1), x, jnp.roll(x, -1, axis=1)]   # circular shifts
    if 3 * C < k_conv_pad:
        pieces.append(jnp.zeros((tb, L, k_conv_pad - 3 * C), dt))

    # Four FixedEmbedding lookups as one multi-hot block.  The sub-tables sit in
    # disjoint rows of the fused 128-row table, so OR-ing the one-hots is exact
    # (no zeros init, no running adds), built directly in the matmul dtype.
    marks = mark_ref[...]
    cols = jax.lax.broadcasted_iota(jnp.int32, (tb, L, _TEMPORAL_ROWS), 2)
    hot = cols == marks[:, :, 0:1]
    for f in range(1, 4):
        hot = hot | (cols == marks[:, :, f:f + 1])
    pieces.append(hot.astype(dt))

    operand = jnp.concatenate(pieces, axis=-1).reshape(tb * L, -1)  # [TB*L, K]

    # Single MXU pass over all TB*L rows, f32 accumulation.
    out = jnp.dot(operand, w_ref[...], preferred_element_type=jnp.float32)
    out = out.reshape(tb, L, -1) + pe_ref[...][None].astype(jnp.float32)
    o_ref[...] = out.astype(o_ref.dtype)                            # lane-dense store


# --------------------------------- wrapper ----------------------------------

def _choose_batch_block(B, L, C, k_total, d_pad, itemsize):
    """Pick TB (batch rows per grid step): fill the MXU M dim (~512 rows), keep
    >= 2 grid steps so the 'parallel' axis shards across v7x's two TensorCores,
    and stay well inside the per-core VMEM budget (v7x: 64 MiB total)."""
    tb = max(1, min(B, pl.cdiv(_TARGET_ROWS, L)))
    if B >= 2 and tb >= B:
        tb = pl.cdiv(B, 2)

    def step_bytes(t):
        # double-buffered x / marks / out blocks + in-kernel fused operand
        return (2 * t * L * (C * itemsize + 4 * 4 + d_pad * itemsize)
                + t * L * k_total * itemsize)

    while tb > 1 and step_bytes(tb) > _VMEM_BUDGET:
        tb = pl.cdiv(tb, 2)
    return tb


@partial(jax.jit, static_argnames=("d_model", "compute_dtype"))
def data_embedding_pallas(x, x_mark, conv_w, *, d_model, compute_dtype=jnp.float32):
    """
    x:       [B, L, C_in] float32
    x_mark:  [B, L, 4]    int   (month, day, weekday, hour)  -- freq='h'
    conv_w:  [D, C_in, 3] float32 (Conv1d weight, circular padding=1, no bias)
    returns: [B, L, D] in compute_dtype (pass bf16 in production to halve writeback)
    """
    B, L, C = x.shape
    D = d_model
    assert x_mark.shape == (B, L, 4), "only freq='h' (4 time features) supported"

    itemsize = jnp.dtype(compute_dtype).itemsize
    k_conv_pad = _round_up(3 * C, _LANE)          # conv block, lane-aligned
    k_total = k_conv_pad + _TEMPORAL_ROWS         # fused contraction dim
    d_pad = _round_up(D, _LANE)                   # lane-dense output width

    # Stacked weight [w_prev; w_cur; w_next; 0-pad; temporal table] -> [K, Dp].
    w_conv = jnp.concatenate(
        [conv_w[:, :, 0].T, conv_w[:, :, 1].T, conv_w[:, :, 2].T], axis=0)   # [3C, D]
    w_conv = jnp.pad(w_conv, ((0, k_conv_pad - 3 * C), (0, d_pad - D)))
    tab = jnp.asarray(_temporal_table_np(D, d_pad))                          # constant
    w_full = jnp.concatenate([w_conv, tab], axis=0).astype(compute_dtype)    # [K, Dp]

    pe = jnp.asarray(_positional_table_np(L, D, d_pad), dtype=compute_dtype)  # [L, Dp]

    x_c = x.astype(compute_dtype)
    # Clamp (nn.Embedding would raise on OOB indices) and pre-offset the marks
    # into the fused 128-row table so the kernel does pure equality compares.
    sizes = jnp.asarray(_TEMPORAL_SIZES, jnp.int32)
    offs = jnp.asarray(_TEMPORAL_OFFSETS, jnp.int32)
    marks = jnp.clip(x_mark.astype(jnp.int32), 0, sizes - 1) + offs

    tb = _choose_batch_block(B, L, C, k_total, d_pad, itemsize)
    grid = (pl.cdiv(B, tb),)

    cost = pl.CostEstimate(
        flops=2 * B * L * d_pad * k_total,
        transcendentals=0,
        bytes_accessed=(x_c.size + w_full.size + pe.size) * itemsize
        + marks.size * 4
        + B * L * d_pad * itemsize,
    )

    grid_spec = pltpu.PrefetchScalarGridSpec(
        num_scalar_prefetch=0,
        grid=grid,
        in_specs=[
            pl.BlockSpec((tb, L, C), lambda b: (b, 0, 0)),
            pl.BlockSpec((tb, L, 4), lambda b: (b, 0, 0)),
            pl.BlockSpec((k_total, d_pad), lambda b: (0, 0)),   # resident weight
            pl.BlockSpec((L, d_pad), lambda b: (0, 0)),         # resident PE
        ],
        out_specs=pl.BlockSpec((tb, L, d_pad), lambda b: (b, 0, 0)),
    )

    out = pl.pallas_call(
        partial(_data_embedding_kernel, k_conv_pad=k_conv_pad),
        out_shape=jax.ShapeDtypeStruct((B, L, d_pad), compute_dtype),
        grid_spec=grid_spec,
        compiler_params=pltpu.CompilerParams(dimension_semantics=("parallel",)),
        cost_estimate=cost,
    )(x_c, marks, w_full, pe)

    if d_pad != D:
        out = out[..., :D]
    # Dropout(p=0.1) is identity at inference time.
    return out


# --------------------------------- reference --------------------------------

def data_embedding_ref(x, x_mark, conv_w, d_model):
    B, L, C = x.shape
    D = d_model
    x_prev = jnp.roll(x, 1, axis=1)
    x_next = jnp.roll(x, -1, axis=1)
    value = (
        jnp.einsum("blc,dc->bld", x_prev, conv_w[:, :, 0])
        + jnp.einsum("blc,dc->bld", x, conv_w[:, :, 1])
        + jnp.einsum("blc,dc->bld", x_next, conv_w[:, :, 2])
    )
    month_t = jnp.asarray(_sinusoid_table_np(13, D))
    day_t = jnp.asarray(_sinusoid_table_np(32, D))
    weekday_t = jnp.asarray(_sinusoid_table_np(7, D))
    hour_t = jnp.asarray(_sinusoid_table_np(24, D))
    temp = (
        jnp.take(hour_t, x_mark[:, :, 3], axis=0)
        + jnp.take(weekday_t, x_mark[:, :, 2], axis=0)
        + jnp.take(day_t, x_mark[:, :, 1], axis=0)
        + jnp.take(month_t, x_mark[:, :, 0], axis=0)
    )
    pe = jnp.asarray(_sinusoid_table_np(L, D))[None]
    return value + temp + pe


# ----------------------------------- main ------------------------------------

if __name__ == "__main__":
    B, L, C_IN, D_MODEL = 2, 16, 4, 32

    key = jax.random.PRNGKey(0)
    k_x, k_w, k_m = jax.random.split(key, 3)

    x = jax.random.normal(k_x, (B, L, C_IN), dtype=jnp.float32)
    # time-mark columns: [month(0..12), day(0..31), weekday(0..6), hour(0..23)]
    maxes = jnp.array([13, 32, 7, 24], dtype=jnp.int32)
    x_mark = (
        jax.random.randint(k_m, (B, L, 4), 0, 1_000_000, dtype=jnp.int32) % maxes
    ).astype(jnp.int32)

    conv_w = kaiming_conv_weight(k_w, C_IN, D_MODEL, 3)

    out = data_embedding_pallas(x, x_mark, conv_w, d_model=D_MODEL)
    out = jax.block_until_ready(out)

    ref = data_embedding_ref(x, x_mark, conv_w, D_MODEL)
    np.testing.assert_allclose(np.asarray(out), np.asarray(ref), rtol=1e-5, atol=1e-5)

    print("KERNEL_OK")
</pallas_src>

<mosaic_0001>
module attributes {stable_mosaic.version = 11 : i64} {
  func.func @_data_embedding_kernel(%arg0: i32, %arg1: memref<1x16x4xf32, #tpu.memory_space<vmem>>, %arg2: memref<1x16x4xi32, #tpu.memory_space<vmem>>, %arg3: memref<256x128xf32, #tpu.memory_space<vmem>>, %arg4: memref<16x128xf32, #tpu.memory_space<vmem>>, %arg5: memref<1x16x128xf32, #tpu.memory_space<vmem>>) attributes {dimension_semantics = [#tpu.dimension_semantics<parallel>], iteration_bounds = array<i64: 2>, scalar_prefetch = 0 : i64, scratch_operands = 0 : i64, tpu.core_type = #tpu.core_type<tc>, window_params = [{transform_indices = @transform_0, window_bounds = array<i64: 1, 16, 4>}, {transform_indices = @transform_1, window_bounds = array<i64: 1, 16, 4>}, {pipeline_mode = #tpu.pipeline_mode<synchronous>, transform_indices = @transform_2, window_bounds = array<i64: 256, 128>}, {pipeline_mode = #tpu.pipeline_mode<synchronous>, transform_indices = @transform_3, window_bounds = array<i64: 16, 128>}, {transform_indices = @transform_4, window_bounds = array<i64: 1, 16, 128>}]} {
    %c0 = arith.constant 0 : index
    %c0_0 = arith.constant 0 : index
    %c0_1 = arith.constant 0 : index
    %0 = vector.load %arg1[%c0, %c0_0, %c0_1] : memref<1x16x4xf32, #tpu.memory_space<vmem>>, vector<1x16x4xf32>
    %1 = vector.extract_strided_slice %0 {offsets = [0, 15, 0], sizes = [1, 1, 4], strides = [1, 1, 1]} : vector<1x16x4xf32> to vector<1x1x4xf32>
    %2 = vector.extract_strided_slice %0 {offsets = [0, 0, 0], sizes = [1, 15, 4], strides = [1, 1, 1]} : vector<1x16x4xf32> to vector<1x15x4xf32>
    %3 = tpu.concatenate %1, %2 in 1 : vector<1x1x4xf32>, vector<1x15x4xf32> -> vector<1x16x4xf32>
    %4 = vector.extract_strided_slice %0 {offsets = [0, 1, 0], sizes = [1, 15, 4], strides = [1, 1, 1]} : vector<1x16x4xf32> to vector<1x15x4xf32>
    %5 = vector.extract_strided_slice %0 {offsets = [0, 0, 0], sizes = [1, 1, 4], strides = [1, 1, 1]} : vector<1x16x4xf32> to vector<1x1x4xf32>
    %6 = tpu.concatenate %4, %5 in 1 : vector<1x15x4xf32>, vector<1x1x4xf32> -> vector<1x16x4xf32>
    %cst = arith.constant 0.000000e+00 : f32
    %7 = vector.broadcast %cst : f32 to vector<1x16x116xf32>
    %c0_2 = arith.constant 0 : index
    %c0_3 = arith.constant 0 : index
    %c0_4 = arith.constant 0 : index
    %8 = vector.load %arg2[%c0_2, %c0_3, %c0_4] : memref<1x16x4xi32, #tpu.memory_space<vmem>>, vector<1x16x4xi32>
    %9 = tpu.iota {dimensions = array<i32: 2>} : vector<1x16x128xi32>
    %10 = vector.extract_strided_slice %8 {offsets = [0, 0, 0], sizes = [1, 16, 1], strides = [1, 1, 1]} : vector<1x16x4xi32> to vector<1x16x1xi32>
    %11 = vector.broadcast %10 : vector<1x16x1xi32> to vector<1x16x128xi32>
    %12 = arith.cmpi eq, %9, %11 : vector<1x16x128xi32>
    %13 = vector.extract_strided_slice %8 {offsets = [0, 0, 1], sizes = [1, 16, 1], strides = [1, 1, 1]} : vector<1x16x4xi32> to vector<1x16x1xi32>
    %14 = vector.broadcast %13 : vector<1x16x1xi32> to vector<1x16x128xi32>
    %15 = arith.cmpi eq, %9, %14 : vector<1x16x128xi32>
    %16 = arith.ori %12, %15 : vector<1x16x128xi1>
    %17 = vector.extract_strided_slice %8 {offsets = [0, 0, 2], sizes = [1, 16, 1], strides = [1, 1, 1]} : vector<1x16x4xi32> to vector<1x16x1xi32>
    %18 = vector.broadcast %17 : vector<1x16x1xi32> to vector<1x16x128xi32>
    %19 = arith.cmpi eq, %9, %18 : vector<1x16x128xi32>
    %20 = arith.ori %16, %19 : vector<1x16x128xi1>
    %21 = vector.extract_strided_slice %8 {offsets = [0, 0, 3], sizes = [1, 16, 1], strides = [1, 1, 1]} : vector<1x16x4xi32> to vector<1x16x1xi32>
    %22 = vector.broadcast %21 : vector<1x16x1xi32> to vector<1x16x128xi32>
    %23 = arith.cmpi eq, %9, %22 : vector<1x16x128xi32>
    %24 = arith.ori %20, %23 : vector<1x16x128xi1>
    %25 = arith.extui %24 : vector<1x16x128xi1> to vector<1x16x128xi32>
    %26 = arith.sitofp %25 : vector<1x16x128xi32> to vector<1x16x128xf32>
    %27 = tpu.concatenate %3, %0, %6, %7, %26 in 2 : vector<1x16x4xf32>, vector<1x16x4xf32>, vector<1x16x4xf32>, vector<1x16x116xf32>, vector<1x16x128xf32> -> vector<1x16x256xf32>
    %28 = vector.shape_cast %27 : vector<1x16x256xf32> to vector<16x256xf32>
    %c0_5 = arith.constant 0 : index
    %c0_6 = arith.constant 0 : index
    %29 = vector.load %arg3[%c0_5, %c0_6] : memref<256x128xf32, #tpu.memory_space<vmem>>, vector<256x128xf32>
    %cst_7 = arith.constant dense<0.000000e+00> : vector<16x128xf32>
    %30 = tpu.matmul %28, %29, %cst_7 {dimension_numbers = #tpu.dot_dimension_numbers<[1], [0], [0], [1], [0, 0, 1, 1], [], []>} : vector<16x256xf32>, vector<256x128xf32>, vector<16x128xf32> -> vector<16x128xf32>
    %31 = vector.shape_cast %30 : vector<16x128xf32> to vector<1x16x128xf32>
    %c0_8 = arith.constant 0 : index
    %c0_9 = arith.constant 0 : index
    %32 = vector.load %arg4[%c0_8, %c0_9] : memref<16x128xf32, #tpu.memory_space<vmem>>, vector<16x128xf32>
    %33 = vector.shape_cast %32 : vector<16x128xf32> to vector<1x16x128xf32>
    %34 = arith.addf %31, %33 : vector<1x16x128xf32>
    %c0_10 = arith.constant 0 : index
    %c0_11 = arith.constant 0 : index
    %c0_12 = arith.constant 0 : index
    %35 = vector.load %arg5[%c0_10, %c0_11, %c0_12] : memref<1x16x128xf32, #tpu.memory_space<vmem>>, vector<1x16x128xf32>
    tpu.vector_store %arg5[%c0_10, %c0_11, %c0_12], %34 {strides = array<i32>} : memref<1x16x128xf32, #tpu.memory_space<vmem>>, vector<1x16x128xf32>,
    return
  }
  func.func @transform_0(%arg0: i32) -> (i32, i32, i32) {
    %c0_i32 = arith.constant 0 : i32
    %c0_i32_0 = arith.constant 0 : i32
    %c0_i32_1 = arith.constant 0 : i32
    return %arg0, %c0_i32, %c0_i32_0 : i32, i32, i32
  }
  func.func @transform_1(%arg0: i32) -> (i32, i32, i32) {
    %c0_i32 = arith.constant 0 : i32
    %c0_i32_0 = arith.constant 0 : i32
    %c0_i32_1 = arith.constant 0 : i32
    return %arg0, %c0_i32, %c0_i32_0 : i32, i32, i32
  }
  func.func @transform_2(%arg0: i32) -> (i32, i32) {
    %c0_i32 = arith.constant 0 : i32
    %c0_i32_0 = arith.constant 0 : i32
    %c0_i32_1 = arith.constant 0 : i32
    return %c0_i32, %c0_i32_0 : i32, i32
  }
  func.func @transform_3(%arg0: i32) -> (i32, i32) {
    %c0_i32 = arith.constant 0 : i32
    %c0_i32_0 = arith.constant 0 : i32
    %c0_i32_1 = arith.constant 0 : i32
    return %c0_i32, %c0_i32_0 : i32, i32
  }
  func.func @transform_4(%arg0: i32) -> (i32, i32, i32) {
    %c0_i32 = arith.constant 0 : i32
    %c0_i32_0 = arith.constant 0 : i32
    %c0_i32_1 = arith.constant 0 : i32
    return %arg0, %c0_i32, %c0_i32_0 : i32, i32, i32
  }
}

</mosaic_0001>

<bundles_post_ra>
// kernel: data_embedding_pallas.1
= control target key start
LH: loop header
LB: loop body
LE: loop exit
PB: predicated region body
PF: predicated region fallthrough
CT: control target
= control target key end

     0   :  { %9 = vsyncpa [#allocation3], 0  ;;  %s967_s0 = inlined_call_operand.vmem [shape: f32[2,16,4], index: 0, kind: input, shape index: {}]   ;;  %s968_s1 = inlined_call_operand.vmem [shape: s32[2,16,4], index: 1, kind: input, shape index: {}]   ;;  %s969_s2 = inlined_call_operand.vmem [shape: f32[256,128], index: 2, kind: input, shape index: {}]   ;;  %s970_s3 = inlined_call_operand.vmem [shape: f32[16,128], index: 3, kind: input, shape index: {}]   ;;  %s971_s4 = inlined_call_operand.hbm [shape: f32[2,16,128], index: 4, kind: output, shape index: {}]  }
   0x1   :  { %11 = vsyncpa [#allocation3 + $0x1], 0  ;;  %s746_s15 = smov 0   ;;  %s748_s16 = smov 0  }
   0x2   :  { %s750_s17 = smov 0   ;;  %s752_s18 = smov 0  }
   0x3 LB: > { %s767_s19 = sadd.s32 4294967295, %s710_s18   ;;  %s504_s20 = sadd.s32 4294967294, %s710_s18   ;;  %s710_s18 = sphi %s752_s18, %s977_s18   ;;  %s706_s17 = sphi %s750_s17, %s976_s17   ;;  %s702_s16 = sphi %s748_s16, %s975_s16   ;;  %s698_s15 = sphi %s746_s15, %s974_s15  }
   0x4   : > { %s771_s21 = sadd.s32 1, %s710_s18   ;;  %s118_s22 = sadd.s32 1, %s706_s17 }
   0x5   : > { %s115_s23 = ssub.s32 %s710_s18, %s771_s21  ;;  %p128_p0 = scmp.ne.s32.totalorder %s706_s17, %s702_s16 }
   0x6   : > { %p116_p1 = scmp.eq.s32.totalorder %s115_s23, 0  ;;  %p129_p2 = scmp.eq.s32.totalorder %s767_s19, 1 }
   0x7   : > { %p134_p3 = scmp.ne.s32.totalorder %s702_s16, %s698_s15  ;;  %p135_p4 = scmp.eq.s32.totalorder %s504_s20, 1 }
   0x8   : > { %s782_s24 = scalar_select %p116_p1, %s706_s17, %s118_s22  }
   0x9   : > { %p784_p5 = por %p129_p2, %p128_p0  ;;  %p788_p6 = por %p135_p4, %p134_p3 }
   0xa   : > { %p507_p7 = scmp.ge.s32.totalorder %s710_s18, 1  ;;  %p175_p8 = scmp.lt.s32.totalorder %s710_s18, 3 }
   0xc   : > { %p176_p9 = pnand %p507_p7, %p175_p8 }
   0xd   : > { %p206_p10 = scmp.lt.s32.totalorder (!%p176_p9), %s767_s19, 1  ;;  %s203_s8 = sand.u32 (!%p176_p9), 1, %s702_s16  }
   0xe   : > { %179 = sbr.rel (%p176_p9) target bundleno = 390 (0x186), region = 36  ;;  %s508_s9 = sshll.u32 (!%p176_p9), %s203_s8, 4 }
   0xf   : > { %s205_s13 = scalar_lea.vmem (!%p176_p9), [#allocation2], %s508_s9  ;;  %s526_s27 = sshll.u32 (!%p176_p9), %s767_s19, 8 }
  0x10   : > { %s924_s29 = scalar_lea.hbm (!%p176_p9), %s971_s4, %s526_s27  ;;  %s926_s30 = scalar_lea.sflag (!%p176_p9), [#allocation3], %s203_s8 }
  0x13   : > { %v712_v0 = vmov 1   ;;  %v713_v1 = vmov 0   ;;  %v334_v2 = vld [vmem:[%s969_s2 + $0xf8] sm:$0xff]  ;;  %v333_v4 = vld [vmem:[%s969_s2 + $0xf0] sm:$0xff]  ;;  %s805_s7 = scalar_select %p206_p10, %s767_s19, 1  ;;  %v332_v6 = vld [vmem:[%s969_s2 + $0xe8] sm:$0xff]  ;;  %v237_v50 = vlaneseq }
  0x14   : > { %645 = vset.pattern.permute.xlu1 %v712_v0  ;;  %644 = vset.pattern.permute.xlu0 %v713_v1  ;;  %v318_v3 = vld [vmem:[%s969_s2 + $0x78] sm:$0xff]  ;;  %v317_v5 = vld [vmem:[%s969_s2 + $0x70] sm:$0xff]  ;;  %v316_v7 = vld [vmem:[%s969_s2 + $0x68] sm:$0xff]  ;;  %v714_v16 = vmov 2   ;;  %vm228_vm0 = vcmask 1046528   ;;  %v715_v26 = vmov 3  }
  0x15   : > { %527 = vmatprep.subr.mxu0 %v334_v2  ;;  %565 = vmatprep.subr.mxu1 %v334_v2  ;;  %s524_s12 = sshll.u32 %s805_s7, 4  ;;  %v331_v9 = vld [vmem:[%s969_s2 + $0xe0] sm:$0xff]  ;;  %v330_v12 = vld [vmem:[%s969_s2 + $0xd8] sm:$0xff]  ;;  %v329_v14 = vld [vmem:[%s969_s2 + $0xd0] sm:$0xff]  ;;  %vm222_vm1 = vcmask 1040384   ;;  %v238_v53 = vand.u32 127, %v237_v50 }
  0x16   : > { %528 = vmatpush3.msra.mxu0 %v318_v3  ;;  %581 = vmatpush3.msra.mxu1 %v318_v3  ;;  %s215_s20 = scalar_lea.vmem %s968_s1, %s524_s12  ;;  %v315_v10 = vld [vmem:[%s969_s2 + $0x60] sm:$0xff]  ;;  %v314_v13 = vld [vmem:[%s969_s2 + $0x58] sm:$0xff]  ;;  %s210_s14 = scalar_lea.vmem %s967_s0, %s524_s12  ;;  %v313_v15 = vld [vmem:[%s969_s2 + $0x50] sm:$0xff]  ;;  %vm294_vm15 = vcmask 31744   ;;  %v718_v58 = vmov 1.0  }
  0x17   : > { %529 = vmatprep.subr.mxu0 %v333_v4  ;;  %566 = vmatprep.subr.mxu1 %v333_v4  ;;  %v235_v8 = vld [vmem:[%s215_s20] sm:$0xff]  ;;  %v236_v11 = vld [vmem:[%s215_s20 + $0x8] sm:$0xff]  ;;  %v326_v28 = vld [vmem:[%s969_s2 + $0xb8] sm:$0xff]  ;;  %s717_s20 = smov 8   ;;  %s719_s19 = smov [#allocation2]  }
  0x18   : > { %530 = vmatpush3.msra.mxu0 %v317_v5  ;;  %582 = vmatpush3.msra.mxu1 %v317_v5  ;;  %v216_v17 = vld [vmem:[%s210_s14] sm:$0xff]  ;;  %v217_v18 = vld [vmem:[%s210_s14 + $0x8] sm:$0xff]  ;;  %v310_v31 = vld [vmem:[%s969_s2 + $0x38] sm:$0xff]  ;;  %s716_s14 = smov 4   ;;  %s654_s6 = sshll.u32 %s719_s19, 4  ;;  %s655_s6 = int_to_ptr.vmem [resolvable:$false] %s654_s6 }
  0x19   : > { %531 = vmatprep.subr.mxu0 %v332_v6  ;;  %567 = vmatprep.subr.mxu1 %v332_v6  ;;  %v328_v19 = vld [vmem:[%s969_s2 + $0xc8] sm:$0xff]  ;;  %v219_v21 = vrot.slane %v217_v18, 7  ;;  %v223_v22 = vrot.slane %v216_v17, 7  ;;  %v230_v23 = vrot.slane %v217_v18, 1  ;;  %v229_v24 = vrot.slane %v216_v17, 1  ;;  %v327_v25 = vld [vmem:[%s969_s2 + $0xc0] sm:$0xff] }
  0x1a   : > { %248 = vperm.xlu1 %645, %v235_v8   ;;  %240 = vperm.xlu0 %644, %v235_v8   ;;  %v312_v20 = vld [vmem:[%s969_s2 + $0x48] sm:$0xff]  ;;  %v311_v27 = vld [vmem:[%s969_s2 + $0x40] sm:$0xff]  ;;  %v325_v32 = vld [vmem:[%s969_s2 + $0xb0] sm:$0xff]  ;;  %s656_s7 = scalar_lea.vmem %s655_s6, 512 }
  0x1b   : > { %532 = vmatpush3.msra.mxu0 %v316_v7  ;;  %583 = vmatpush3.msra.mxu1 %v316_v7  ;;  %v856_v29 = vsel %vm222_vm1, %v219_v21, %v223_v22  ;;  %v231_v30 = vsel %vm228_vm0, %v229_v24, %v230_v23  ;;  %v865_v33 = vsel %vm222_vm1, %v223_v22, %v219_v21  ;;  %v309_v34 = vld [vmem:[%s969_s2 + $0x30] sm:$0xff]  ;;  %v324_v35 = vld [vmem:[%s969_s2 + $0xa8] sm:$0xff]  ;;  %v323_v37 = vld [vmem:[%s969_s2 + $0xa0] sm:$0xff]  ;;  %vm297_vm1 = vcmask 64512  }
  0x1c   : > { %533 = vmatprep.subr.mxu0 %v331_v9  ;;  %568 = vmatprep.subr.mxu1 %v331_v9  ;;  %v308_v36 = vld [vmem:[%s969_s2 + $0x28] sm:$0xff]  ;;  %v307_v38 = vld [vmem:[%s969_s2 + $0x20] sm:$0xff]  ;;  %v234_v39 = vsel %vm228_vm0, %v230_v23, %v229_v24  ;;  %v322_v40 = vld [vmem:[%s969_s2 + $0x98] sm:$0xff] }
  0x1d   : > { %534 = vmatpush3.msra.mxu0 %v315_v10  ;;  %584 = vmatpush3.msra.mxu1 %v315_v10  ;;  %v306_v41 = vld [vmem:[%s969_s2 + $0x18] sm:$0xff]  ;;  %v321_v42 = vld [vmem:[%s969_s2 + $0x90] sm:$0xff]  ;;  %v320_v44 = vld [vmem:[%s969_s2 + $0x88] sm:$0xff] }
  0x1e   : > { %251 = vperm.xlu1 %645, %v236_v11   ;;  %243 = vperm.xlu0 %644, %v236_v11   ;;  %v305_v43 = vld [vmem:[%s969_s2 + $0x10] sm:$0xff]  ;;  %v304_v45 = vld [vmem:[%s969_s2 + $0x8] sm:$0xff]  ;;  %v319_v46 = vld [vmem:[%s969_s2 + $0x80] sm:$0xff] }
  0x1f   : > { %535 = vmatprep.subr.mxu0 %v330_v12  ;;  %569 = vmatprep.subr.mxu1 %v330_v12  ;;  %v303_v47 = vld [vmem:[%s969_s2] sm:$0xff]  ;;  %v411_v10 = vld [vmem:[%s970_s3 + $0x8] sm:$0xff] }
  0x20   : > { %536 = vmatpush3.msra.mxu0 %v314_v13  ;;  %585 = vmatpush3.msra.mxu1 %v314_v13  ;;  %v410_v5 = vld [vmem:[%s970_s3] sm:$0xff] }
  0x21   : > { %537 = vmatprep.subr.mxu0 %v329_v14  ;;  %570 = vmatprep.subr.mxu1 %v329_v14 }
  0x22   : > { %647 = vset.pattern.permute.xlu1 %v714_v16  ;;  %646 = vset.pattern.permute.xlu0 %v714_v16 }
  0x23   : > { %261 = vperm.xlu1 %647, %v236_v11   ;;  %258 = vperm.xlu0 %646, %v235_v8  }
  0x24   : > { %538 = vmatpush3.msra.mxu0 %v313_v15  ;;  %586 = vmatpush3.msra.mxu1 %v313_v15 }
  0x25   : > { %539 = vmatprep.subr.mxu0 %v328_v19  ;;  %571 = vmatprep.subr.mxu1 %v328_v19 }
  0x26   : > { %540 = vmatpush3.msra.mxu0 %v312_v20  ;;  %587 = vmatpush3.msra.mxu1 %v312_v20 }
  0x27   : > { %648 = vset.pattern.permute.xlu1 %v715_v26  ;;  %649 = vset.pattern.permute.xlu0 %v715_v26 }
  0x28   : > { %268 = vperm.xlu1 %648, %v235_v8   ;;  %271 = vperm.xlu0 %649, %v236_v11  }
  0x29   : > { %541 = vmatprep.subr.mxu0 %v327_v25  ;;  %572 = vmatprep.subr.mxu1 %v327_v25 }
  0x2a   : > { %542 = vmatpush3.msra.mxu0 %v311_v27  ;;  %588 = vmatpush3.msra.mxu1 %v311_v27 }
  0x2b   : > { %543 = vmatprep.subr.mxu0 %v326_v28  ;;  %573 = vmatprep.subr.mxu1 %v326_v28 }
  0x2c   : > { %281 = vrot.lane.b32.xlu1 %v216_v17, %s716_s14  ;;  %288 = vrot.lane.b32.xlu0 %v231_v30, %s717_s20 }
  0x2d   : > { %544 = vmatpush3.msra.mxu0 %v310_v31  ;;  %589 = vmatpush3.msra.mxu1 %v310_v31 }
  0x2e   : > { %545 = vmatprep.subr.mxu0 %v325_v32  ;;  %574 = vmatprep.subr.mxu1 %v325_v32 }
  0x2f   : > { %546 = vmatpush3.msra.mxu0 %v309_v34  ;;  %590 = vmatpush3.msra.mxu1 %v309_v34 }
  0x30   : > { %283 = vrot.lane.b32.xlu1 %v217_v18, %s716_s14  ;;  %547 = vmatprep.subr.mxu0 %v324_v35  ;;  %s430_s14 = sshll.u32 %s205_s13, 4  ;;  %s919_s14 = int_to_ptr.vmem [resolvable:$true] %s430_s14 }
  0x31   : > { %548 = vmatpush3.msra.mxu0 %v308_v36  ;;  %575 = vmatprep.subr.mxu1 %v324_v35  ;;  %s650_s5 = scalar_lea.vmem %s919_s14, 256  ;;  %p657_p0 = scmp.lt.s32.totalorder %s919_s14, %s655_s6 }
  0x32   : > { %549 = vmatprep.subr.mxu0 %v323_v37  ;;  %591 = vmatpush3.msra.mxu1 %v308_v36  ;;  %p651_p11 = scmp.ne.s32.totalorder %s919_s14, %s650_s5  ;;  %p658_p1 = scmp.lt.s32.totalorder %s656_s7, %s650_s5 }
  0x33   : > { %550 = vmatpush3.msra.mxu0 %v307_v38  ;;  %576 = vmatprep.subr.mxu1 %v323_v37 }
  0x34   : > { %290 = vrot.lane.b32.xlu1 %v234_v39, %s717_s20  ;;  %551 = vmatprep.subr.mxu0 %v322_v40  ;;  %p652_p12 = pnand %p651_p11, %p784_p5  ;;  %p659_p2 = por %p658_p1, %p657_p0 }
  0x35   : > { %552 = vmatpush3.msra.mxu0 %v306_v41  ;;  %592 = vmatpush3.msra.mxu1 %v307_v38 }
  0x36   : > { %553 = vmatprep.subr.mxu0 %v321_v42  ;;  %577 = vmatprep.subr.mxu1 %v322_v40  ;;  %p653_p13 = pneg %p652_p12 }
  0x37   : > { %554 = vmatpush3.msra.mxu0 %v305_v43  ;;  %593 = vmatpush3.msra.mxu1 %v306_v41 }
  0x38   : > { %555 = vmatprep.subr.mxu0 %v320_v44  ;;  %578 = vmatprep.subr.mxu1 %v321_v42  ;;  %p660_p3 = pnand %p659_p2, %p653_p13 }
  0x39   : > { %556 = vmatpush3.msra.mxu0 %v304_v45  ;;  %594 = vmatpush3.msra.mxu1 %v305_v43 }
  0x3a   : > { %557 = vmatprep.subr.mxu0 %v319_v46  ;;  %579 = vmatprep.subr.mxu1 %v320_v44 }
  0x3b   : > { %558 = vmatpush3.msra.mxu0 %v303_v47  ;;  %595 = vmatpush3.msra.mxu1 %v304_v45 }
  0x3c   : > { %580 = vmatprep.subr.mxu1 %v319_v46 }
  0x3d   : > { %596 = vmatpush3.msra.mxu1 %v303_v47 }
  0x95   : > { %v249_v48 = vpop.permute.xlu1 %248  ;;  %v241_v49 = vpop.permute.xlu0 %240 }
  0x96   : > { %vm253_vm2 = vcmp.eq.s32.totalorder %v238_v53, %v249_v48  ;;  %vm245_vm3 = vcmp.eq.s32.totalorder %v238_v53, %v241_v49 }
  0x97   : > { %vm255_vm7 = vmor %vm245_vm3, %vm253_vm2  ;;  %vm300_vm2 = vcmask 97280  }
  0x99   : > { %v252_v51 = vpop.permute.xlu1 %251  ;;  %v244_v52 = vpop.permute.xlu0 %243 }
  0x9a   : > { %vm254_vm4 = vcmp.eq.s32.totalorder %v238_v53, %v252_v51  ;;  %vm246_vm5 = vcmp.eq.s32.totalorder %v238_v53, %v244_v52 }
  0x9b   : > { %vm256_vm9 = vmor %vm246_vm5, %vm254_vm4 }
  0x9e   : > { %v262_v54 = vpop.permute.xlu1 %261  ;;  %v259_v55 = vpop.permute.xlu0 %258 }
  0x9f   : > { %vm263_vm6 = vcmp.eq.s32.totalorder %v238_v53, %v259_v55  ;;  %vm264_vm8 = vcmp.eq.s32.totalorder %v238_v53, %v262_v54 }
  0xa0   : > { %vm265_vm10 = vmor %vm255_vm7, %vm263_vm6 }
  0xa1   : > { %vm266_vm13 = vmor %vm256_vm9, %vm264_vm8 }
  0xa3   : > { %v269_v56 = vpop.permute.xlu1 %268  ;;  %v272_v57 = vpop.permute.xlu0 %271 }
  0xa4   : > { %vm273_vm11 = vcmp.eq.s32.totalorder %v238_v53, %v269_v56  ;;  %vm274_vm12 = vcmp.eq.s32.totalorder %v238_v53, %v272_v57 }
  0xa5   : > { %vm275_vm14 = vmor %vm265_vm10, %vm273_vm11 }
  0xa6   : > { %515 = vmatprep.mubr.msk.f32.mxu0 %vm275_vm14, %v718_v58  ;;  %vm276_vm0 = vmor %vm266_vm13, %vm274_vm12 }
  0xa7   : > { %517 = vmatprep.mubr.msk.f32.mxu1 %vm276_vm0, %v718_v58  ;;  %v282_v59 = vpop.permute.xlu1 %281  ;;  %v289_v60 = vpop.permute.xlu0 %288 }
  0xa8   : > { %v295_v61 = vsel %vm294_vm15, %v856_v29, %v282_v59 }
  0xa9   : > { %v298_v62 = vsel %vm297_vm1, %v295_v61, %v289_v60 }
  0xaa   : > { %516 = vmatmul.mubr.msk.f32.vlgmr.msra.gmra.mxu0 %vm300_vm2, %v298_v62 }
  0xab   : > { %v284_v63 = vpop.permute.xlu1 %283 }
  0xac   : > { %v296_v0 = vsel %vm294_vm15, %v865_v33, %v284_v63 }
  0xaf   : > { %v291_v1 = vpop.permute.xlu1 %290 }
  0xb0   : > { %v299_v2 = vsel %vm297_vm1, %v296_v0, %v291_v1 }
  0xb1   : > { %518 = vmatmul.mubr.msk.f32.vlgmr.msra.gmra.mxu1 %vm300_vm2, %v299_v2 }
 0x16a   : > { %v559_v3 = vpop.f32.mrf.mxu0 }
 0x16c   : > { %v560_v4 = vpop.f32.mrf.mxu0 }
 0x16d   : > { %v561_v6 = vadd.f32 %v560_v4, %v559_v3 }
 0x16f   : > { %v412_v7 = vadd.f32 %v561_v6, %v410_v5 }
 0x171   : > { %414 = vst [vmem:[%s205_s13] sm:$0xff] %v412_v7  ;;  %v562_v8 = vpop.f32.mrf.mxu1 }
 0x173   : > { %v563_v9 = vpop.f32.mrf.mxu1 }
 0x174   : > { %v564_v11 = vadd.f32 %v563_v9, %v562_v8 }
 0x176   : > { %v413_v12 = vadd.f32 %v564_v11, %v411_v10 }
 0x178   : > { %415 = vst [vmem:[%s205_s13 + $0x8] sm:$0xff] %v413_v12 }
 0x179   : > { %663 = shalt.err (!%p660_p3)
}
 0x17a   : > { %s664_s8 = scalar_lea.hbm %s924_s29, 256  ;;  %s668_s11 = scalar_lea.hbm %s971_s4, 512 }
 0x17b   : > { %p665_p4 = scmp.ne.s32.totalorder %s924_s29, %s664_s8  ;;  %p669_p9 = scmp.lt.s32.totalorder %s924_s29, %s971_s4 }
 0x17c   : > { %p670_p10 = scmp.lt.s32.totalorder %s668_s11, %s664_s8 }
 0x17d   : > { %p666_p7 = pnand %p665_p4, %p784_p5 }
 0x17e   : > { %p671_p11 = por %p670_p10, %p669_p9 }
 0x17f   : > { %p667_p8 = pneg %p666_p7 }
 0x181   : > { %p672_p12 = pnand %p671_p11, %p667_p8 }
 0x183   : > { %675 = shalt.err (!%p672_p12)
}
 0x184   : > { %s720_s23 = smov 128  }
 0x185   : > { %597 = dma.vmem_to_hbm [thread:$0]  (%p784_p5), %s919_s14, 256, %s924_s29, %s926_s30, %s720_s23, %s720_s23, %s717_s20  }
 0x186 PF: > { %p603_p13 = scmp.ge.s32.totalorder %s710_s18, 2  ;;  %s445_s27 = sand.u32 1, %s698_s15  }
 0x187   : > { %s446_s12 = scalar_lea.sflag [#allocation3], %s445_s27 }
 0x188   : > { %p600_p0 = pnand %p603_p13, %p788_p6 }
 0x18a   : > { %p601_p1 = pneg %p600_p0 }
 0x18c   : > { %693 = dma.done.wait (%p601_p1), %s446_s12, 256  }
 0x18d   : > { %695 = vsyncadd (%p601_p1), %s446_s12, 4294967040  ;;  %p14_p2 = scmp.ge.s32.totalorder %s771_s21, 4   ;;  %s974_s15 = smov %s702_s16 }
 0x18e   : > { %s975_s16 = smov %s706_s17  ;;  %s976_s17 = smov %s782_s24 }
 0x18f   : > { %s977_s18 = smov %s771_s21  ;;  %16 = sbr.rel (!%p14_p2) target bundleno = 3 (0x3), region = 74 }
 0x194   :  { %451 = vsyncpa [#allocation3], 1 }
 0x195   :  { %453 = vsyncpa [#allocation3 + $0x1], 1 }

</bundles_post_ra>
